<compile_context>
chip_gen: v7x
topology: tpu7x:2x2x1
jax: 0.10.0
libtpu: 0.0.40
codegen_flags: <defaults>
</compile_context>

<pallas_src>
from functools import partial

import jax
import jax.numpy as jnp
from jax.experimental import pallas as pl
from jax.experimental.pallas import tpu as pltpu


def mha_kernel(x_ref, wq_ref, wk_ref, wv_ref, wp_ref, b_ref, o_ref, *,
               norm, num_heads):
    # x_ref  : (1, N, C)  one batch element
    # wq_ref : (H, C, D)  per-head query projection panels (bf16, VMEM-resident)
    # wk_ref : (H, C, D)  per-head key projection panels   (bf16)
    # wv_ref : (H, C, D)  per-head value projection panels (bf16)
    # wp_ref : (H, D, C)  per-head slices of the output projection (bf16)
    # b_ref  : (1, C)     output projection bias (f32)
    # o_ref  : (1, N, C)  output tile (written exactly once per grid step)
    H = num_heads
    N = x_ref.shape[1]
    C = x_ref.shape[2]

    x = x_ref[0].astype(jnp.bfloat16)                 # (N, C) bf16
    xb = jnp.broadcast_to(x[None], (H, N, C))         # (H, N, C) bf16 (hoisted)

    wq = wq_ref[...]                                  # (H, C, D) bf16
    wk = wk_ref[...]
    wv = wv_ref[...]
    wp = wp_ref[...]                                  # (H, D, C) bf16

    # Per-head projections as batched MXU matmuls (batch dim = head), f32 acc.
    q = jnp.einsum('hnc,hcd->hnd', xb, wq, preferred_element_type=jnp.float32)
    k = jnp.einsum('hnc,hcd->hnd', xb, wk, preferred_element_type=jnp.float32)
    v = jnp.einsum('hnc,hcd->hnd', xb, wv, preferred_element_type=jnp.float32)

    # Fold the 1/sqrt(dim_per_head) scale into q: N*D elements, not N*N.
    q = (q * norm).astype(jnp.bfloat16)
    k = k.astype(jnp.bfloat16)

    # Scores: contract over the head dim D.  (H, N, N) f32.
    scores = jnp.einsum('hnd,hmd->hnm', q, k,
                        preferred_element_type=jnp.float32)

    # f32 softmax along the key axis; denominator via EUP approx reciprocal.
    scores = scores - jnp.max(scores, axis=-1, keepdims=True)
    e = jnp.exp(scores)
    inv = pl.reciprocal(jnp.sum(e, axis=-1, keepdims=True), approx=True)
    attn = (e * inv).astype(jnp.bfloat16)             # (H, N, N) bf16

    head_out = jnp.einsum('hnm,hmd->hnd', attn, v.astype(jnp.bfloat16),
                          preferred_element_type=jnp.float32)    # (H, N, D)

    # Per-head slice of the output projection, then reduce over heads (cheap
    # vreg-accumulate over the leading dim) and add the bias.
    proj = jnp.einsum('hnd,hdc->hnc', head_out.astype(jnp.bfloat16), wp,
                      preferred_element_type=jnp.float32)        # (H, N, C)
    out = jnp.sum(proj, axis=0) + b_ref[...].astype(jnp.float32)  # (N, C)

    o_ref[0] = out.astype(o_ref.dtype)


def multi_head_attention(x, w_qkv, w_proj, b_proj, *, num_heads, dim_per_head=64):
    """x: (B, N, C); w_qkv: (3C, C); w_proj: (C, C); b_proj: (C,)."""
    B, N, C = x.shape
    assert C % num_heads == 0, "feature_dim must be divisible by num_heads"
    H = num_heads
    D = C // H
    norm = float(dim_per_head) ** (-0.5)

    # Host-side glue: split the fused qkv / proj weights into per-head panels
    # so the kernel never slices or concatenates along the lane dimension.
    # w_qkv output features are ordered as (qkv, head, d): f = (s*H + h)*D + d.
    w4 = w_qkv.reshape(3, H, D, C)                                   # [s,h,d,c]
    wq = jnp.transpose(w4[0], (0, 2, 1)).astype(jnp.bfloat16)        # (H, C, D)
    wk = jnp.transpose(w4[1], (0, 2, 1)).astype(jnp.bfloat16)        # (H, C, D)
    wv = jnp.transpose(w4[2], (0, 2, 1)).astype(jnp.bfloat16)        # (H, C, D)
    wp = jnp.transpose(w_proj, (1, 0)).reshape(H, D, C).astype(jnp.bfloat16)  # (H, D, C)
    b2 = b_proj.reshape(1, C).astype(jnp.float32)

    kern = partial(mha_kernel, norm=norm, num_heads=H)

    return pl.pallas_call(
        kern,
        out_shape=jax.ShapeDtypeStruct((B, N, C), x.dtype),
        grid_spec=pltpu.PrefetchScalarGridSpec(
            num_scalar_prefetch=0,
            grid=(B,),
            in_specs=[
                pl.BlockSpec((1, N, C), lambda b: (b, 0, 0)),   # x (per batch)
                # Constant block index => weights DMA'd once, VMEM-resident.
                pl.BlockSpec((H, C, D), lambda b: (0, 0, 0)),   # wq panels
                pl.BlockSpec((H, C, D), lambda b: (0, 0, 0)),   # wk panels
                pl.BlockSpec((H, C, D), lambda b: (0, 0, 0)),   # wv panels
                pl.BlockSpec((H, D, C), lambda b: (0, 0, 0)),   # wp panels
                pl.BlockSpec((1, C),    lambda b: (0, 0)),      # bias
            ],
            out_specs=pl.BlockSpec((1, N, C), lambda b: (b, 0, 0)),
        ),
        compiler_params=pltpu.CompilerParams(
            dimension_semantics=("parallel",),
            vmem_limit_bytes=32 * 1024 * 1024),
    )(x, wq, wk, wv, wp, b2)


def ref_multi_head_attention(x, w_qkv, w_proj, b_proj, *, num_heads, dim_per_head=64):
    """Pure-JAX f32 reference mirroring the PyTorch forward exactly."""
    B, N, C = x.shape
    D = C // num_heads
    norm = float(dim_per_head) ** (-0.5)
    qkv = x @ w_qkv.T                                            # (B, N, 3C)
    qkv = qkv.reshape(B, N, 3, num_heads, D).transpose(2, 0, 3, 1, 4)
    q, k, v = qkv[0], qkv[1], qkv[2]                             # (B, H, N, D)
    scores = jnp.einsum('bhnd,bhmd->bhnm', q, k) * norm
    attn = jax.nn.softmax(scores, axis=-1)
    out = jnp.einsum('bhnm,bhmd->bhnd', attn, v)
    out = out.transpose(0, 2, 1, 3).reshape(B, N, C)
    return out @ w_proj.T + b_proj


if __name__ == "__main__":
    # Small shapes consistent with the module: B=2, N=8 tokens, C=32 features,
    # 4 heads (head dim 8), dim_per_head=64 (constructor default, only sets norm).
    B, N, C = 2, 8, 32
    num_heads = 4

    key = jax.random.PRNGKey(0)
    kx, kqkv, kw, kb = jax.random.split(key, 4)

    x = jax.random.normal(kx, (B, N, C), dtype=jnp.float32)
    # Deterministic synthetic parameters (roughly Linear-scale init).
    w_qkv = jax.random.normal(kqkv, (3 * C, C), dtype=jnp.float32) * (C ** -0.5)
    w_proj = jax.random.normal(kw, (C, C), dtype=jnp.float32) * (C ** -0.5)
    b_proj = jax.random.normal(kb, (C,), dtype=jnp.float32) * 0.01

    out = multi_head_attention(x, w_qkv, w_proj, b_proj,
                               num_heads=num_heads, dim_per_head=64)
    out = jax.block_until_ready(out)

    ref = ref_multi_head_attention(x, w_qkv, w_proj, b_proj,
                                   num_heads=num_heads, dim_per_head=64)
    assert out.shape == (B, N, C)

    # bf16 matmuls + approx reciprocal => compare relative to activation scale.
    err = float(jnp.max(jnp.abs(out - ref)))
    scale = float(jnp.max(jnp.abs(ref))) + 1e-6
    assert err / scale < 5e-2, f"mismatch vs reference: rel_err={err / scale:.4f}"

    print("KERNEL_OK")
</pallas_src>

<mosaic_0001>
module attributes {stable_mosaic.version = 11 : i64} {
  func.func @mha_kernel(%arg0: i32, %arg1: memref<1x8x32xf32, #tpu.memory_space<vmem>>, %arg2: memref<4x32x8xbf16, #tpu.memory_space<vmem>>, %arg3: memref<4x32x8xbf16, #tpu.memory_space<vmem>>, %arg4: memref<4x32x8xbf16, #tpu.memory_space<vmem>>, %arg5: memref<4x8x32xbf16, #tpu.memory_space<vmem>>, %arg6: memref<1x32xf32, #tpu.memory_space<vmem>>, %arg7: memref<1x8x32xf32, #tpu.memory_space<vmem>>) attributes {dimension_semantics = [#tpu.dimension_semantics<parallel>], iteration_bounds = array<i64: 2>, scalar_prefetch = 0 : i64, scratch_operands = 0 : i64, tpu.core_type = #tpu.core_type<tc>, window_params = [{transform_indices = @transform_0, window_bounds = array<i64: 1, 8, 32>}, {pipeline_mode = #tpu.pipeline_mode<synchronous>, transform_indices = @transform_1, window_bounds = array<i64: 4, 32, 8>}, {pipeline_mode = #tpu.pipeline_mode<synchronous>, transform_indices = @transform_2, window_bounds = array<i64: 4, 32, 8>}, {pipeline_mode = #tpu.pipeline_mode<synchronous>, transform_indices = @transform_3, window_bounds = array<i64: 4, 32, 8>}, {pipeline_mode = #tpu.pipeline_mode<synchronous>, transform_indices = @transform_4, window_bounds = array<i64: 4, 8, 32>}, {pipeline_mode = #tpu.pipeline_mode<synchronous>, transform_indices = @transform_5, window_bounds = array<i64: 1, 32>}, {transform_indices = @transform_6, window_bounds = array<i64: 1, 8, 32>}]} {
    %c0 = arith.constant 0 : index
    %c0_0 = arith.constant 0 : index
    %c0_1 = arith.constant 0 : index
    %0 = vector.load %arg1[%c0, %c0_0, %c0_1] : memref<1x8x32xf32, #tpu.memory_space<vmem>>, vector<1x8x32xf32>
    %1 = vector.shape_cast %0 : vector<1x8x32xf32> to vector<8x32xf32>
    %2 = arith.truncf %1 : vector<8x32xf32> to vector<8x32xbf16>
    %3 = vector.shape_cast %2 : vector<8x32xbf16> to vector<1x8x32xbf16>
    %4 = vector.shape_cast %3 : vector<1x8x32xbf16> to vector<1x8x32xbf16>
    %5 = vector.broadcast %4 : vector<1x8x32xbf16> to vector<4x8x32xbf16>
    %c0_2 = arith.constant 0 : index
    %c0_3 = arith.constant 0 : index
    %c0_4 = arith.constant 0 : index
    %6 = vector.load %arg2[%c0_2, %c0_3, %c0_4] : memref<4x32x8xbf16, #tpu.memory_space<vmem>>, vector<4x32x8xbf16>
    %c0_5 = arith.constant 0 : index
    %c0_6 = arith.constant 0 : index
    %c0_7 = arith.constant 0 : index
    %7 = vector.load %arg3[%c0_5, %c0_6, %c0_7] : memref<4x32x8xbf16, #tpu.memory_space<vmem>>, vector<4x32x8xbf16>
    %c0_8 = arith.constant 0 : index
    %c0_9 = arith.constant 0 : index
    %c0_10 = arith.constant 0 : index
    %8 = vector.load %arg4[%c0_8, %c0_9, %c0_10] : memref<4x32x8xbf16, #tpu.memory_space<vmem>>, vector<4x32x8xbf16>
    %c0_11 = arith.constant 0 : index
    %c0_12 = arith.constant 0 : index
    %c0_13 = arith.constant 0 : index
    %9 = vector.load %arg5[%c0_11, %c0_12, %c0_13] : memref<4x8x32xbf16, #tpu.memory_space<vmem>>, vector<4x8x32xbf16>
    "tpu.trace_start"() <{level = 10 : i32, message = "hnc,hcd->hnd"}> : () -> ()
    %cst = arith.constant dense<0.000000e+00> : vector<4x8x8xf32>
    %10 = tpu.matmul %5, %6, %cst {dimension_numbers = #tpu.dot_dimension_numbers<[2], [1], [1], [2], [0, 0, 0, 1, 1, 2], [0], [0]>} : vector<4x8x32xbf16>, vector<4x32x8xbf16>, vector<4x8x8xf32> -> vector<4x8x8xf32>
    %cst_14 = arith.constant dense<0.000000e+00> : vector<4x8x8xf32>
    %11 = tpu.matmul %5, %7, %cst_14 {dimension_numbers = #tpu.dot_dimension_numbers<[2], [1], [1], [2], [0, 0, 0, 1, 1, 2], [0], [0]>} : vector<4x8x32xbf16>, vector<4x32x8xbf16>, vector<4x8x8xf32> -> vector<4x8x8xf32>
    %cst_15 = arith.constant dense<0.000000e+00> : vector<4x8x8xf32>
    %12 = tpu.matmul %5, %8, %cst_15 {dimension_numbers = #tpu.dot_dimension_numbers<[2], [1], [1], [2], [0, 0, 0, 1, 1, 2], [0], [0]>} : vector<4x8x32xbf16>, vector<4x32x8xbf16>, vector<4x8x8xf32> -> vector<4x8x8xf32>
    "tpu.trace_stop"() : () -> ()
    %cst_16 = arith.constant 1.250000e-01 : f32
    %13 = vector.broadcast %cst_16 : f32 to vector<4x8x8xf32>
    %14 = arith.mulf %10, %13 : vector<4x8x8xf32>
    %15 = arith.truncf %14 : vector<4x8x8xf32> to vector<4x8x8xbf16>
    %16 = arith.truncf %11 : vector<4x8x8xf32> to vector<4x8x8xbf16>
    "tpu.trace_start"() <{level = 10 : i32, message = "hnd,hmd->hnm"}> : () -> ()
    %cst_17 = arith.constant dense<0.000000e+00> : vector<4x8x8xf32>
    %17 = tpu.matmul %15, %16, %cst_17 {dimension_numbers = #tpu.dot_dimension_numbers<[2], [2], [1], [1], [0, 0, 0, 1, 1, 1], [0], [0]>} : vector<4x8x8xbf16>, vector<4x8x8xbf16>, vector<4x8x8xf32> -> vector<4x8x8xf32>
    "tpu.trace_stop"() : () -> ()
    %cst_18 = arith.constant dense<0xFF800000> : vector<4x8xf32>
    %18 = vector.multi_reduction <maximumf>, %17, %cst_18 [2] : vector<4x8x8xf32> to vector<4x8xf32>
    %19 = vector.shape_cast %18 : vector<4x8xf32> to vector<4x8x1xf32>
    %20 = vector.broadcast %19 : vector<4x8x1xf32> to vector<4x8x8xf32>
    %21 = arith.subf %17, %20 : vector<4x8x8xf32>
    %22 = math.exp %21 : vector<4x8x8xf32>
    %cst_19 = arith.constant dense<0.000000e+00> : vector<4x8xf32>
    %23 = vector.multi_reduction <add>, %22, %cst_19 [2] : vector<4x8x8xf32> to vector<4x8xf32>
    %24 = vector.shape_cast %23 : vector<4x8xf32> to vector<4x8x1xf32>
    %25 = tpu.reciprocal %24 {approx = true} : vector<4x8x1xf32> -> vector<4x8x1xf32>
    %26 = vector.broadcast %25 : vector<4x8x1xf32> to vector<4x8x8xf32>
    %27 = arith.mulf %22, %26 : vector<4x8x8xf32>
    %28 = arith.truncf %27 : vector<4x8x8xf32> to vector<4x8x8xbf16>
    %29 = arith.truncf %12 : vector<4x8x8xf32> to vector<4x8x8xbf16>
    "tpu.trace_start"() <{level = 10 : i32, message = "hnm,hmd->hnd"}> : () -> ()
    %cst_20 = arith.constant dense<0.000000e+00> : vector<4x8x8xf32>
    %30 = tpu.matmul %28, %29, %cst_20 {dimension_numbers = #tpu.dot_dimension_numbers<[2], [1], [1], [2], [0, 0, 0, 1, 1, 2], [0], [0]>} : vector<4x8x8xbf16>, vector<4x8x8xbf16>, vector<4x8x8xf32> -> vector<4x8x8xf32>
    "tpu.trace_stop"() : () -> ()
    %31 = arith.truncf %30 : vector<4x8x8xf32> to vector<4x8x8xbf16>
    "tpu.trace_start"() <{level = 10 : i32, message = "hnd,hdc->hnc"}> : () -> ()
    %cst_21 = arith.constant dense<0.000000e+00> : vector<4x8x32xf32>
    %32 = tpu.matmul %31, %9, %cst_21 {dimension_numbers = #tpu.dot_dimension_numbers<[2], [1], [1], [2], [0, 0, 0, 1, 1, 2], [0], [0]>} : vector<4x8x8xbf16>, vector<4x8x32xbf16>, vector<4x8x32xf32> -> vector<4x8x32xf32>
    "tpu.trace_stop"() : () -> ()
    %cst_22 = arith.constant dense<0.000000e+00> : vector<8x32xf32>
    %33 = vector.multi_reduction <add>, %32, %cst_22 [0] : vector<4x8x32xf32> to vector<8x32xf32>
    %c0_23 = arith.constant 0 : index
    %c0_24 = arith.constant 0 : index
    %34 = vector.load %arg6[%c0_23, %c0_24] : memref<1x32xf32, #tpu.memory_space<vmem>>, vector<1x32xf32>
    %35 = vector.broadcast %34 : vector<1x32xf32> to vector<8x32xf32>
    %36 = arith.addf %33, %35 : vector<8x32xf32>
    %c0_25 = arith.constant 0 : index
    %c0_26 = arith.constant 0 : index
    %c0_27 = arith.constant 0 : index
    %37 = vector.load %arg7[%c0_25, %c0_26, %c0_27] : memref<1x8x32xf32, #tpu.memory_space<vmem>>, vector<1x8x32xf32>
    %38 = vector.shape_cast %37 : vector<1x8x32xf32> to vector<8x32xf32>
    %39 = vector.shape_cast %36 : vector<8x32xf32> to vector<1x8x32xf32>
    tpu.vector_store %arg7[%c0_25, %c0_26, %c0_27], %39 {strides = array<i32>} : memref<1x8x32xf32, #tpu.memory_space<vmem>>, vector<1x8x32xf32>,
    return
  }
  func.func @transform_0(%arg0: i32) -> (i32, i32, i32) {
    %c0_i32 = arith.constant 0 : i32
    %c0_i32_0 = arith.constant 0 : i32
    %c0_i32_1 = arith.constant 0 : i32
    return %arg0, %c0_i32, %c0_i32_0 : i32, i32, i32
  }
  func.func @transform_1(%arg0: i32) -> (i32, i32, i32) {
    %c0_i32 = arith.constant 0 : i32
    %c0_i32_0 = arith.constant 0 : i32
    %c0_i32_1 = arith.constant 0 : i32
    %c0_i32_2 = arith.constant 0 : i32
    return %c0_i32, %c0_i32_0, %c0_i32_1 : i32, i32, i32
  }
  func.func @transform_2(%arg0: i32) -> (i32, i32, i32) {
    %c0_i32 = arith.constant 0 : i32
    %c0_i32_0 = arith.constant 0 : i32
    %c0_i32_1 = arith.constant 0 : i32
    %c0_i32_2 = arith.constant 0 : i32
    return %c0_i32, %c0_i32_0, %c0_i32_1 : i32, i32, i32
  }
  func.func @transform_3(%arg0: i32) -> (i32, i32, i32) {
    %c0_i32 = arith.constant 0 : i32
    %c0_i32_0 = arith.constant 0 : i32
    %c0_i32_1 = arith.constant 0 : i32
    %c0_i32_2 = arith.constant 0 : i32
    return %c0_i32, %c0_i32_0, %c0_i32_1 : i32, i32, i32
  }
  func.func @transform_4(%arg0: i32) -> (i32, i32, i32) {
    %c0_i32 = arith.constant 0 : i32
    %c0_i32_0 = arith.constant 0 : i32
    %c0_i32_1 = arith.constant 0 : i32
    %c0_i32_2 = arith.constant 0 : i32
    return %c0_i32, %c0_i32_0, %c0_i32_1 : i32, i32, i32
  }
  func.func @transform_5(%arg0: i32) -> (i32, i32) {
    %c0_i32 = arith.constant 0 : i32
    %c0_i32_0 = arith.constant 0 : i32
    %c0_i32_1 = arith.constant 0 : i32
    return %c0_i32, %c0_i32_0 : i32, i32
  }
  func.func @transform_6(%arg0: i32) -> (i32, i32, i32) {
    %c0_i32 = arith.constant 0 : i32
    %c0_i32_0 = arith.constant 0 : i32
    %c0_i32_1 = arith.constant 0 : i32
    return %arg0, %c0_i32, %c0_i32_0 : i32, i32, i32
  }
}

</mosaic_0001>

<bundles_post_ra>
// kernel: tpu_custom_call.1
= control target key start
LH: loop header
LB: loop body
LE: loop exit
PB: predicated region body
PF: predicated region fallthrough
CT: control target
= control target key end

     0   :  { %11 = vsyncpa [#allocation3], 0  ;;  %s2453_s0 = inlined_call_operand.vmem [shape: f32[2,8,32], index: 0, kind: input, shape index: {}]   ;;  %s2454_s1 = inlined_call_operand.vmem [shape: bf16[4,32,8], index: 1, kind: input, shape index: {}]   ;;  %s2455_s2 = inlined_call_operand.vmem [shape: bf16[4,32,8], index: 2, kind: input, shape index: {}]   ;;  %s2456_s3 = inlined_call_operand.vmem [shape: bf16[4,32,8], index: 3, kind: input, shape index: {}]   ;;  %s2457_s4 = inlined_call_operand.vmem [shape: bf16[4,8,32], index: 4, kind: input, shape index: {}]   ;;  %s2458_s5 = inlined_call_operand.vmem [shape: f32[1,32], index: 5, kind: input, shape index: {}]   ;;  %s2459_s6 = inlined_call_operand.hbm [shape: f32[2,8,32], index: 6, kind: output, shape index: {}]  }
   0x1   :  { %13 = vsyncpa [#allocation3 + $0x1], 0  ;;  %s2111_s21 = smov 0   ;;  %s2113_s22 = smov 0  }
   0x2   :  { %s2115_s23 = smov 0   ;;  %s2117_s24 = smov 0  }
   0x3 LB: > { %s2132_s25 = sadd.s32 4294967295, %s2071_s24   ;;  %s1641_s26 = sadd.s32 4294967294, %s2071_s24   ;;  %s2071_s24 = sphi %s2117_s24, %s2465_s24   ;;  %s2067_s23 = sphi %s2115_s23, %s2464_s23   ;;  %s2063_s22 = sphi %s2113_s22, %s2463_s22   ;;  %s2059_s21 = sphi %s2111_s21, %s2462_s21  }
   0x4   : > { %s2136_s27 = sadd.s32 1, %s2071_s24   ;;  %s157_s28 = sadd.s32 1, %s2067_s23 }
   0x5   : > { %s154_s29 = ssub.s32 %s2071_s24, %s2136_s27  ;;  %p167_p0 = scmp.ne.s32.totalorder %s2067_s23, %s2063_s22 }
   0x6   : > { %p155_p1 = scmp.eq.s32.totalorder %s154_s29, 0  ;;  %p168_p2 = scmp.eq.s32.totalorder %s2132_s25, 1 }
   0x7   : > { %p173_p3 = scmp.ne.s32.totalorder %s2063_s22, %s2059_s21  ;;  %p174_p4 = scmp.eq.s32.totalorder %s1641_s26, 1 }
   0x8   : > { %s2147_s30 = scalar_select %p155_p1, %s2067_s23, %s157_s28  }
   0x9   : > { %p2149_p5 = por %p168_p2, %p167_p0  ;;  %p2153_p6 = por %p174_p4, %p173_p3 }
   0xa   : > { %p1644_p7 = scmp.ge.s32.totalorder %s2071_s24, 1  ;;  %p214_p8 = scmp.lt.s32.totalorder %s2071_s24, 3 }
   0xc   : > { %p215_p9 = pnand %p1644_p7, %p214_p8 }
   0xd   : > { %v1969_v0 = vld [vmem:[%s2454_s1] sm:$0xff] (!%p215_p9)   ;;  %v2073_v1 = vmov (!%p215_p9), 0.0   ;;  %v1970_v2 = vld [vmem:[%s2454_s1 + $0x10] sm:$0xff] (!%p215_p9)   ;;  %v1971_v3 = vld [vmem:[%s2454_s1 + $0x8] sm:$0xff] (!%p215_p9)   ;;  %vm2074_vm0 = vmmov (!%p215_p9), 0   ;;  %p243_p10 = scmp.lt.s32.totalorder (!%p215_p9), %s2132_s25, 1 }
   0xe   : > { %218 = sbr.rel (%p215_p9) target bundleno = 1251 (0x4e3), region = 44  ;;  %1760 = vmatprep.subr.bf16.mxu0 (!%p215_p9), %v2073_v1  ;;  %1768 = vmatprep.subr.bf16.mxu1 (!%p215_p9), %v2073_v1  ;;  %v1972_v4 = vld [vmem:[%s2454_s1 + $0x18] sm:$0xff] (!%p215_p9)   ;;  %v1973_v5 = vld [vmem:[%s2454_s1 + $0x20] sm:$0xff] (!%p215_p9)   ;;  %v1974_v6 = vld [vmem:[%s2454_s1 + $0x30] sm:$0xff] (!%p215_p9)   ;;  %vm314_vm1 = vcmask (!%p215_p9), 261120   ;;  %vm942_vm2 = vcmask (!%p215_p9), 64512  }
   0xf   : > { %1761 = vmatpush3.bf16.msra.mxu0 (!%p215_p9), %v1969_v0  ;;  %1764 = vmatprep.mubr.msk.bf16.mxu0 (!%p215_p9), %vm2074_vm0, %v2073_v1  ;;  %v1975_v9 = vld [vmem:[%s2454_s1 + $0x28] sm:$0xff] (!%p215_p9)   ;;  %v1976_v10 = vld [vmem:[%s2454_s1 + $0x38] sm:$0xff] (!%p215_p9)   ;;  %v1977_v11 = vld [vmem:[%s2455_s2] sm:$0xff] (!%p215_p9)   ;;  %vm1182_vm3 = vcmask (!%p215_p9), 1043456   ;;  %s240_s10 = sand.u32 (!%p215_p9), 1, %s2063_s22   ;;  %s1697_s14 = sshll.u32 (!%p215_p9), %s2132_s25, 7 }
  0x10   : > { %1769 = vmatpush3.bf16.msra.mxu1 (!%p215_p9), %v1970_v2  ;;  %1762 = vmatprep.subr.bf16.mxu0 (!%p215_p9), %v2073_v1  ;;  %v1978_v12 = vld [vmem:[%s2455_s2 + $0x10] sm:$0xff] (!%p215_p9)   ;;  %v1979_v13 = vld [vmem:[%s2455_s2 + $0x8] sm:$0xff] (!%p215_p9)   ;;  %v1980_v14 = vld [vmem:[%s2455_s2 + $0x18] sm:$0xff] (!%p215_p9)   ;;  %s1645_s11 = sshll.u32 (!%p215_p9), %s240_s10, 3  ;;  %s2410_s19 = scalar_lea.hbm (!%p215_p9), %s2459_s6, %s1697_s14 }
  0x11   : > { %1770 = vmatprep.subr.bf16.mxu1 (!%p215_p9), %v2073_v1  ;;  %1772 = vmatprep.mubr.msk.bf16.mxu1 (!%p215_p9), %vm2074_vm0, %v2073_v1  ;;  %v1981_v15 = vld [vmem:[%s2455_s2 + $0x20] sm:$0xff] (!%p215_p9)   ;;  %v1982_v16 = vld [vmem:[%s2455_s2 + $0x30] sm:$0xff] (!%p215_p9)   ;;  %v1983_v17 = vld [vmem:[%s2455_s2 + $0x28] sm:$0xff] (!%p215_p9)   ;;  %s242_s15 = scalar_lea.vmem (!%p215_p9), [#allocation2], %s1645_s11  ;;  %s1569_s20 = scalar_lea.sflag (!%p215_p9), [#allocation3], %s240_s10 }
  0x12   : > { %v1984_v18 = vld [vmem:[%s2455_s2 + $0x38] sm:$0xff] (!%p215_p9)   ;;  %v1985_v19 = vld [vmem:[%s2456_s3] sm:$0xff] (!%p215_p9)   ;;  %v1986_v20 = vld [vmem:[%s2456_s3 + $0x10] sm:$0xff] (!%p215_p9)   ;;  %s1582_s16 = sshll.u32 (!%p215_p9), %s242_s15, 4  ;;  %s2075_s26 = smov (!%p215_p9), [#allocation2]   ;;  %s2412_s16 = int_to_ptr.vmem [resolvable:$true] %s1582_s16 }
  0x13   : > { %1763 = vmatpush3.bf16.msra.mxu0 (!%p215_p9), %v1971_v3  ;;  %v1987_v21 = vld [vmem:[%s2456_s3 + $0x8] sm:$0xff] (!%p215_p9)   ;;  %v1988_v22 = vld [vmem:[%s2456_s3 + $0x18] sm:$0xff] (!%p215_p9)   ;;  %v1989_v23 = vld [vmem:[%s2456_s3 + $0x20] sm:$0xff] (!%p215_p9)   ;;  %s2013_s28 = sshll.u32 (!%p215_p9), %s2075_s26, 4  ;;  %s2014_s28 = int_to_ptr.vmem [resolvable:$false] %s2013_s28 }
  0x14   : > { %1771 = vmatpush3.bf16.msra.mxu1 (!%p215_p9), %v1972_v4  ;;  %1776 = vmatprep.subr.bf16.mxu0 (!%p215_p9), %v2073_v1  ;;  %v1990_v24 = vld [vmem:[%s2456_s3 + $0x30] sm:$0xff] (!%p215_p9)   ;;  %v1991_v25 = vld [vmem:[%s2456_s3 + $0x28] sm:$0xff] (!%p215_p9)   ;;  %v1992_v26 = vld [vmem:[%s2456_s3 + $0x38] sm:$0xff] (!%p215_p9)   ;;  %p2016_p0 = scmp.lt.s32.totalorder (!%p215_p9), %s2412_s16, %s2014_s28 }
  0x15   : > { %s244_s17 = scalar_select %p243_p10, %s2132_s25, 1  ;;  %1784 = vmatprep.subr.bf16.mxu1 %v2073_v1 }
  0x16   : > { %s2009_s25 = scalar_lea.vmem %s2412_s16, 128 }
  0x17   : > { %s1646_s18 = sshll.u32 %s244_s17, 3  ;;  %p2010_p11 = scmp.ne.s32.totalorder %s2412_s16, %s2009_s25 }
  0x18   : > { %s246_s29 = scalar_lea.vmem %s2453_s0, %s1646_s18 }
  0x19   : > { %v248_v7 = vld [vmem:[%s246_s29] sm:$0xff]  ;;  %p2011_p12 = pnand %p2010_p11, %p2149_p5  ;;  %s2015_s29 = scalar_lea.vmem %s2014_s28, 256 }
  0x1a   : > { %v2192_v8 = vpack.c.bf16 %v248_v7, %v248_v7  ;;  %p2017_p1 = scmp.lt.s32.totalorder %s2015_s29, %s2009_s25 }
  0x1b   : > { %p2012_p13 = pneg %p2011_p12 }
  0x1c   : > { %1765 = vmatmul.mubr.msk.bf16.vlgmr.msra.gmra.mrb[0].mxu0 %vm314_vm1, %v2192_v8  ;;  %1773 = vmatmul.mubr.msk.bf16.vlgmr.msra.gmra.mrb[0].mxu1 %vm314_vm1, %v2192_v8  ;;  %p2018_p2 = por %p2017_p1, %p2016_p0 }
  0x1d   : > { %1777 = vmatpush3.bf16.msra.mxu0 %v1973_v5  ;;  %1785 = vmatpush3.bf16.msra.mxu1 %v1974_v6 }
  0x1e   : > { %1778 = vmatprep.subr.bf16.mxu0 %v2073_v1  ;;  %1786 = vmatprep.subr.bf16.mxu1 %v2073_v1  ;;  %p2019_p3 = pnand %p2018_p2, %p2012_p13 }
  0x1f   : > { %1780 = vmatprep.mubr.msk.bf16.mxu0 %vm2074_vm0, %v2073_v1  ;;  %1788 = vmatprep.mubr.msk.bf16.mxu1 %vm2074_vm0, %v2073_v1 }
  0x21   : > { %1779 = vmatpush3.bf16.msra.mxu0 %v1975_v9  ;;  %1787 = vmatpush3.bf16.msra.mxu1 %v1976_v10 }
  0x22   : > { %1792 = vmatprep.subr.bf16.mxu0 %v2073_v1  ;;  %1800 = vmatprep.subr.bf16.mxu1 %v2073_v1 }
  0x24   : > { %1781 = vmatmul.mubr.msk.bf16.vlgmr.msra.gmra.mrb[4].mxu0 %vm314_vm1, %v2192_v8  ;;  %1789 = vmatmul.mubr.msk.bf16.vlgmr.msra.gmra.mrb[4].mxu1 %vm314_vm1, %v2192_v8 }
  0x25   : > { %1793 = vmatpush3.bf16.msra.mxu0 %v1977_v11  ;;  %1801 = vmatpush3.bf16.msra.mxu1 %v1978_v12 }
  0x26   : > { %1794 = vmatprep.subr.bf16.mxu0 %v2073_v1  ;;  %1802 = vmatprep.subr.bf16.mxu1 %v2073_v1 }
  0x27   : > { %1796 = vmatprep.mubr.msk.bf16.mxu0 %vm2074_vm0, %v2073_v1  ;;  %1804 = vmatprep.mubr.msk.bf16.mxu1 %vm2074_vm0, %v2073_v1 }
  0x29   : > { %1795 = vmatpush3.bf16.msra.mxu0 %v1979_v13  ;;  %1803 = vmatpush3.bf16.msra.mxu1 %v1980_v14 }
  0x2a   : > { %1808 = vmatprep.subr.bf16.mxu0 %v2073_v1  ;;  %1816 = vmatprep.subr.bf16.mxu1 %v2073_v1 }
  0x2c   : > { %1797 = vmatmul.mubr.msk.bf16.vlgmr.msra.gmra.mrb[8].mxu0 %vm314_vm1, %v2192_v8  ;;  %1805 = vmatmul.mubr.msk.bf16.vlgmr.msra.gmra.mrb[8].mxu1 %vm314_vm1, %v2192_v8 }
  0x2d   : > { %1809 = vmatpush3.bf16.msra.mxu0 %v1981_v15  ;;  %1817 = vmatpush3.bf16.msra.mxu1 %v1982_v16 }
  0x2e   : > { %1810 = vmatprep.subr.bf16.mxu0 %v2073_v1  ;;  %1818 = vmatprep.subr.bf16.mxu1 %v2073_v1 }
  0x2f   : > { %1812 = vmatprep.mubr.msk.bf16.mxu0 %vm2074_vm0, %v2073_v1  ;;  %1820 = vmatprep.mubr.msk.bf16.mxu1 %vm2074_vm0, %v2073_v1 }
  0x31   : > { %1811 = vmatpush3.bf16.msra.mxu0 %v1983_v17  ;;  %1819 = vmatpush3.bf16.msra.mxu1 %v1984_v18 }
  0x32   : > { %1824 = vmatprep.subr.bf16.mxu0 %v2073_v1  ;;  %1832 = vmatprep.subr.bf16.mxu1 %v2073_v1 }
  0x34   : > { %1813 = vmatmul.mubr.msk.bf16.vlgmr.msra.gmra.mrb[12].mxu0 %vm314_vm1, %v2192_v8  ;;  %1821 = vmatmul.mubr.msk.bf16.vlgmr.msra.gmra.mrb[12].mxu1 %vm314_vm1, %v2192_v8 }
  0x35   : > { %1825 = vmatpush3.bf16.msra.mxu0 %v1985_v19  ;;  %1833 = vmatpush3.bf16.msra.mxu1 %v1986_v20 }
  0x36   : > { %1826 = vmatprep.subr.bf16.mxu0 %v2073_v1  ;;  %1834 = vmatprep.subr.bf16.mxu1 %v2073_v1 }
  0x37   : > { %1828 = vmatprep.mubr.msk.bf16.mxu0 %vm2074_vm0, %v2073_v1  ;;  %1836 = vmatprep.mubr.msk.bf16.mxu1 %vm2074_vm0, %v2073_v1 }
  0x39   : > { %1827 = vmatpush3.bf16.msra.mxu0 %v1987_v21  ;;  %1835 = vmatpush3.bf16.msra.mxu1 %v1988_v22 }
  0x3a   : > { %1840 = vmatprep.subr.bf16.mxu0 %v2073_v1  ;;  %1848 = vmatprep.subr.bf16.mxu1 %v2073_v1 }
  0x3c   : > { %1829 = vmatmul.mubr.msk.bf16.vlgmr.msra.gmra.mrb[16].mxu0 %vm314_vm1, %v2192_v8  ;;  %1837 = vmatmul.mubr.msk.bf16.vlgmr.msra.gmra.mrb[16].mxu1 %vm314_vm1, %v2192_v8 }
  0x3d   : > { %1841 = vmatpush3.bf16.msra.mxu0 %v1989_v23  ;;  %1844 = vmatprep.mubr.msk.bf16.mxu0 %vm2074_vm0, %v2073_v1 }
  0x3e   : > { %1842 = vmatprep.subr.bf16.mxu0 %v2073_v1  ;;  %1849 = vmatpush3.bf16.msra.mxu1 %v1990_v24 }
  0x3f   : > { %1852 = vmatprep.mubr.msk.bf16.mxu1 %vm2074_vm0, %v2073_v1  ;;  %1850 = vmatprep.subr.bf16.mxu1 %v2073_v1 }
  0x41   : > { %1843 = vmatpush3.bf16.msra.mxu0 %v1991_v25 }
  0x42   : > { %1851 = vmatpush3.bf16.msra.mxu1 %v1992_v26  ;;  %1856 = vmatprep.subr.bf16.mxu0 %v2073_v1 }
  0x43   : > { %1862 = vmatprep.subr.bf16.mxu1 %v2073_v1 }
  0x44   : > { %1845 = vmatmul.mubr.msk.bf16.vlgmr.msra.gmra.mrb[20].mxu0 %vm314_vm1, %v2192_v8 }
  0x45   : > { %1853 = vmatmul.mubr.msk.bf16.vlgmr.msra.gmra.mrb[20].mxu1 %vm314_vm1, %v2192_v8  ;;  %1858 = vmatprep.mubr.msk.bf16.mxu0 %vm2074_vm0, %v2073_v1 }
  0x46   : > { %1864 = vmatprep.mubr.msk.bf16.mxu1 %vm2074_vm0, %v2073_v1 }
  0xef   : > { %v352_v27 = vpop.f32.mrb[0].mxu0  ;;  %v404_v28 = vpop.f32.mrb[0].mxu1 }
  0xf0   : > { %v1766_v29 = vpop.f32.mrb[1].mxu0  ;;  %v1774_v30 = vpop.f32.mrb[1].mxu1  ;;  %v930_v55 = vmul.f32 0.125, %v352_v27  ;;  %v931_v56 = vmul.f32 0.125, %v404_v28 }
  0xf1   : > { %v355_v31 = vpop.f32.mrb[2].mxu0  ;;  %v407_v32 = vpop.f32.mrb[2].mxu1 }
  0xf2   : > { %v1767_v33 = vpop.f32.mrb[3].mxu0  ;;  %v1775_v34 = vpop.f32.mrb[3].mxu1  ;;  %v934_v59 = vpack.c.bf16 %v930_v55, %v930_v55  ;;  %v935_v60 = vpack.c.bf16 %v931_v56, %v931_v56 }
  0xf7   : > { %v456_v35 = vpop.f32.mrb[4].mxu0  ;;  %v508_v36 = vpop.f32.mrb[4].mxu1 }
  0xf8   : > { %v1782_v37 = vpop.f32.mrb[5].mxu0  ;;  %v1790_v38 = vpop.f32.mrb[5].mxu1  ;;  %v932_v8 = vmul.f32 0.125, %v456_v35  ;;  %v933_v9 = vmul.f32 0.125, %v508_v36 }
  0xf9   : > { %v459_v39 = vpop.f32.mrb[6].mxu0  ;;  %v511_v40 = vpop.f32.mrb[6].mxu1 }
  0xfa   : > { %v1783_v41 = vpop.f32.mrb[7].mxu0  ;;  %v1791_v42 = vpop.f32.mrb[7].mxu1  ;;  %v936_v10 = vpack.c.bf16 %v932_v8, %v932_v8  ;;  %v937_v11 = vpack.c.bf16 %v933_v9, %v933_v9 }
  0xff   : > { %v560_v43 = vpop.f32.mrb[8].mxu0  ;;  %v612_v44 = vpop.f32.mrb[8].mxu1 }
 0x100   : > { %v938_v45 = vpack.c.bf16 %v560_v43, %v560_v43  ;;  %v939_v46 = vpack.c.bf16 %v612_v44, %v612_v44  ;;  %v1798_v47 = vpop.f32.mrb[9].mxu0  ;;  %v1806_v48 = vpop.f32.mrb[9].mxu1 }
 0x101   : > { %v563_v49 = vpop.f32.mrb[10].mxu0  ;;  %v615_v50 = vpop.f32.mrb[10].mxu1 }
 0x102   : > { %v947_v51 = vsel %vm942_vm2, %v938_v45, 0  ;;  %v993_v52 = vsel %vm942_vm2, %v939_v46, 0  ;;  %v1799_v53 = vpop.f32.mrb[11].mxu0  ;;  %v1807_v54 = vpop.f32.mrb[11].mxu1 }
 0x103   : > { %1857 = vmatpush3.bf16.xpose.msra.mxu0 %v947_v51  ;;  %1863 = vmatpush3.bf16.xpose.msra.mxu1 %v993_v52 }
 0x104   : > { %1868 = vmatprep.subr.bf16.mxu0 %v2073_v1  ;;  %1874 = vmatprep.subr.bf16.mxu1 %v2073_v1 }
 0x107   : > { %v664_v57 = vpop.f32.mrb[12].mxu0  ;;  %v716_v58 = vpop.f32.mrb[12].mxu1 }
 0x108   : > { %v940_v61 = vpack.c.bf16 %v664_v57, %v664_v57  ;;  %v941_v62 = vpack.c.bf16 %v716_v58, %v716_v58  ;;  %v1814_v63 = vpop.f32.mrb[13].mxu0  ;;  %v1822_v0 = vpop.f32.mrb[13].mxu1 }
 0x109   : > { %v667_v2 = vpop.f32.mrb[14].mxu0  ;;  %v719_v3 = vpop.f32.mrb[14].mxu1 }
 0x10a   : > { %v1039_v4 = vsel %vm942_vm2, %v940_v61, 0  ;;  %v1085_v5 = vsel %vm942_vm2, %v941_v62, 0  ;;  %v1815_v6 = vpop.f32.mrb[15].mxu0  ;;  %1859 = vmatmul.mubr.msk.bf16.vlgmr.msra.gmra.mrb[24].mxu0 %vm942_vm2, %v934_v59  ;;  %1865 = vmatmul.mubr.msk.bf16.vlgmr.msra.gmra.mrb[24].mxu1 %vm942_vm2, %v935_v60  ;;  %v1823_v7 = vpop.f32.mrb[15].mxu1 }
 0x10b   : > { %1869 = vmatpush3.bf16.xpose.msra.mxu0 %v1039_v4  ;;  %1875 = vmatpush3.bf16.xpose.msra.mxu1 %v1085_v5 }
 0x10c   : > { %1870 = vmatprep.mubr.msk.bf16.mxu0 %vm2074_vm0, %v2073_v1  ;;  %1876 = vmatprep.mubr.msk.bf16.mxu1 %vm2074_vm0, %v2073_v1 }
 0x10d   : > { %1880 = vmatprep.subr.bf16.mxu0 %v2073_v1  ;;  %1886 = vmatprep.subr.bf16.mxu1 %v2073_v1 }
 0x10f   : > { %v768_v12 = vpop.f32.mrb[16].mxu0  ;;  %v820_v16 = vpop.f32.mrb[16].mxu1 }
 0x110   : > { %v1175_v13 = vpack.c.bf16 %v768_v12, %v768_v12  ;;  %v1830_v14 = vpop.f32.mrb[17].mxu0  ;;  %v1176_v19 = vpack.c.bf16 %v820_v16, %v820_v16  ;;  %v1838_v20 = vpop.f32.mrb[17].mxu1 }
 0x111   : > { %v771_v15 = vpop.f32.mrb[18].mxu0  ;;  %v823_v21 = vpop.f32.mrb[18].mxu1 }
 0x112   : > { %1871 = vmatmul.mubr.msk.bf16.vlgmr.msra.gmra.mrb[28].mxu0 %vm942_vm2, %v936_v10  ;;  %1877 = vmatmul.mubr.msk.bf16.vlgmr.msra.gmra.mrb[28].mxu1 %vm942_vm2, %v937_v11  ;;  %v1184_v17 = vsel %vm1182_vm3, %v1175_v13, 0  ;;  %v1831_v18 = vpop.f32.mrb[19].mxu0  ;;  %v1230_v22 = vsel %vm1182_vm3, %v1176_v19, 0  ;;  %v1839_v23 = vpop.f32.mrb[19].mxu1 }
 0x113   : > { %1882 = vmatprep.mubr.msk.bf16.mxu0 %vm2074_vm0, %v2073_v1  ;;  %1888 = vmatprep.mubr.msk.bf16.mxu1 %vm2074_vm0, %v2073_v1  ;;  %v298_v23 = vld [vmem:[%s2457_s4] sm:$0xf] }
 0x114   : > { %1881 = vmatpush3.bf16.msra.mxu0 %v1184_v17  ;;  %1887 = vmatpush3.bf16.msra.mxu1 %v1230_v22 }
 0x115   : > { %1892 = vmatprep.subr.bf16.mxu0 %v2073_v1  ;;  %1898 = vmatprep.subr.bf16.mxu1 %v2073_v1 }
 0x117   : > { %v2340_v24 = vpop.f32.mrb[20].mxu0 }
 0x118   : > { %v2342_v25 = vpop.f32.mrb[20].mxu1  ;;  %v1846_v26 = vpop.f32.mrb[21].mxu0  ;;  %v1177_v13 = vpack.c.bf16 %v2340_v24, %v2340_v24 }
 0x119   : > { %v1854_v27 = vpop.f32.mrb[21].mxu1  ;;  %v875_v28 = vpop.f32.mrb[22].mxu0  ;;  %v1178_v19 = vpack.c.bf16 %v2342_v25, %v2342_v25 }
 0x11a   : > { %v927_v29 = vpop.f32.mrb[22].mxu1  ;;  %v1847_v30 = vpop.f32.mrb[23].mxu0  ;;  %v1276_v18 = vsel %vm1182_vm3, %v1177_v13, 0  ;;  %v1372_v27 = vsel %vm1182_vm3, %v298_v23, 0 }
 0x11b   : > { %v1855_v31 = vpop.f32.mrb[23].mxu1  ;;  %v1322_v24 = vsel %vm1182_vm3, %v1178_v19, 0 }
 0x11c   : > { %v299_v31 = vld [vmem:[%s2457_s4 + $0x4] sm:$0xf] }
 0x1dd   : > { %v983_v32 = vpop.f32.mrb[24].mxu0  ;;  %v1029_v33 = vpop.f32.mrb[24].mxu1 }
 0x1de   : > { %v1860_v34 = vpop.f32.mrb[25].mxu0  ;;  %v1866_v35 = vpop.f32.mrb[25].mxu1  ;;  %v1127_v36 = vsel %vm942_vm2, %v983_v32, -inf  ;;  %v1130_v41 = vsel %vm942_vm2, %v1029_v33, -inf }
 0x1df   : > { %v1032_v37 = vpop.f32.mrb[26].mxu1  ;;  %1128 = vmax.xlane.f32.xlu0 %v1127_v36  ;;  %v986_v38 = vpop.f32.mrb[26].mxu0 }
 0x1e0   : > { %v1861_v39 = vpop.f32.mrb[27].mxu0  ;;  %v1867_v40 = vpop.f32.mrb[27].mxu1 }
 0x1e1   : > { %v301_v39 = vld [vmem:[%s2457_s4 + $0xc] sm:$0xf] }
 0x1e3   : > { %1131 = vmax.xlane.f32.xlu0 %v1130_v41 }
 0x1e5   : > { %v1075_v42 = vpop.f32.mrb[28].mxu0  ;;  %v1121_v43 = vpop.f32.mrb[28].mxu1 }
 0x1e6   : > { %v1872_v44 = vpop.f32.mrb[29].mxu0  ;;  %v1878_v45 = vpop.f32.mrb[29].mxu1  ;;  %v1133_v46 = vsel %vm942_vm2, %v1075_v42, -inf  ;;  %v1136_v51 = vsel %vm942_vm2, %v1121_v43, -inf }
 0x1e7   : > { %v1124_v47 = vpop.f32.mrb[30].mxu1  ;;  %1134 = vmax.xlane.f32.xlu1 %v1133_v46  ;;  %v1078_v48 = vpop.f32.mrb[30].mxu0  ;;  %v1510_v44 = vsel %vm1182_vm3, %v301_v39, 0 }
 0x1e8   : > { %v1873_v49 = vpop.f32.mrb[31].mxu0  ;;  %v1879_v50 = vpop.f32.mrb[31].mxu1 }
 0x1eb   : > { %1137 = vmax.xlane.f32.xlu1 %v1136_v51 }
 0x26c   : > { %v1129_v52 = vpop.xlane.xlu0 %1128 }
 0x26d   : > { %v1139_v53 = vsub.f32 %v983_v32, %v1129_v52  ;;  %v1418_v32 = vsel %vm1182_vm3, %v299_v31, 0 }
 0x26f   : > { %v1143_v54 = vmul.f32 1.442695, %v1139_v53 }
 0x270   : > { %v1132_v55 = vpop.xlane.xlu0 %1131 }
 0x271   : > { %1993 = vpow2.f32 %v1143_v54  ;;  %v1140_v56 = vsub.f32 %v1029_v33, %v1132_v55  ;;  %v300_v33 = vld [vmem:[%s2457_s4 + $0x8] sm:$0xf] }
 0x272   : > { %v1464_v37 = vsel %vm1182_vm3, %v300_v33, 0 }
 0x273   : > { %v1145_v57 = vmul.f32 1.442695, %v1140_v56 }
 0x274   : > { %v1135_v58 = vpop.xlane.xlu1 %1134 }
 0x275   : > { %1995 = vpow2.f32 %v1145_v57  ;;  %v1141_v59 = vsub.f32 %v1075_v42, %v1135_v58 }
 0x277   : > { %v1147_v60 = vmul.f32 1.442695, %v1141_v59 }
 0x278   : > { %v1138_v61 = vpop.xlane.xlu1 %1137 }
 0x279   : > { %1997 = vpow2.f32 %v1147_v60  ;;  %v1142_v62 = vsub.f32 %v1121_v43, %v1138_v61 }
 0x27b   : > { %v1994_v63 = vpop.eup %1993  ;;  %v1149_v0 = vmul.f32 1.442695, %v1142_v62 }
 0x27c   : > { %v1151_v2 = vsel %vm942_vm2, %v1994_v63, 0.0 }
 0x27d   : > { %1999 = vpow2.f32 %v1149_v0  ;;  %1152 = vadd.xlane.f32.xlu0 %v1151_v2 }
 0x27f   : > { %v1996_v3 = vpop.eup %1995 }
 0x280   : > { %v1154_v4 = vsel %vm942_vm2, %v1996_v3, 0.0 }
 0x281   : > { %1155 = vadd.xlane.f32.xlu1 %v1154_v4 }
 0x283   : > { %v1998_v5 = vpop.eup %1997 }
 0x284   : > { %v1157_v6 = vsel %vm942_vm2, %v1998_v5, 0.0 }
 0x285   : > { %1158 = vadd.xlane.f32.xlu0 %v1157_v6 }
 0x287   : > { %v2000_v7 = vpop.eup %1999 }
 0x288   : > { %v1160_v8 = vsel %vm942_vm2, %v2000_v7, 0.0 }
 0x289   : > { %1161 = vadd.xlane.f32.xlu1 %v1160_v8 }
 0x30a   : > { %v1153_v9 = vpop.xlane.xlu0 %1152 }
 0x30b   : > { %2001 = vrcp.f32 %v1153_v9 }
 0x30e   : > { %v1156_v10 = vpop.xlane.xlu1 %1155 }
 0x30f   : > { %2003 = vrcp.f32 %v1156_v10 }
 0x312   : > { %v1159_v11 = vpop.xlane.xlu0 %1158 }
 0x313   : > { %2005 = vrcp.f32 %v1159_v11 }
 0x315   : > { %v2002_v12 = vpop.eup %2001 }
 0x316   : > { %v1167_v14 = vmul.f32 %v2002_v12, %v1994_v63  ;;  %v1162_v15 = vpop.xlane.xlu1 %1161  ;;  %v1695_v12 = vld [vmem:[%s2458_s5] ss:$0 sm:$0xff] }
 0x317   : > { %2007 = vrcp.f32 %v1162_v15 }
 0x318   : > { %v1171_v16 = vpack.c.bf16 %v1167_v14, %v1167_v14 }
 0x319   : > { %v2004_v17 = vpop.eup %2003 }
 0x31a   : > { %v1168_v20 = vmul.f32 %v2004_v17, %v1996_v3  ;;  %1883 = vmatmul.mubr.msk.bf16.vlgmr.msra.gmra.mrb[32].mxu0 %vm942_vm2, %v1171_v16 }
 0x31b   : > { %1893 = vmatpush3.bf16.msra.mxu0 %v1276_v18  ;;  %1894 = vmatprep.mubr.msk.bf16.mxu0 %vm2074_vm0, %v2073_v1 }
 0x31c   : > { %v1172_v21 = vpack.c.bf16 %v1168_v20, %v1168_v20  ;;  %1904 = vmatprep.subr.bf16.mxu0 %v2073_v1 }
 0x31d   : > { %v2006_v22 = vpop.eup %2005 }
 0x31e   : > { %v1169_v26 = vmul.f32 %v2006_v22, %v1998_v5  ;;  %1889 = vmatmul.mubr.msk.bf16.vlgmr.msra.gmra.mrb[32].mxu1 %vm942_vm2, %v1172_v21 }
 0x31f   : > { %1899 = vmatpush3.bf16.msra.mxu1 %v1322_v24  ;;  %1900 = vmatprep.mubr.msk.bf16.mxu1 %vm2074_vm0, %v2073_v1 }
 0x320   : > { %v1173_v25 = vpack.c.bf16 %v1169_v26, %v1169_v26  ;;  %1910 = vmatprep.subr.bf16.mxu1 %v2073_v1 }
 0x321   : > { %v2008_v28 = vpop.eup %2007 }
 0x322   : > { %v1170_v29 = vmul.f32 %v2008_v28, %v2000_v7  ;;  %1895 = vmatmul.mubr.msk.bf16.vlgmr.msra.gmra.mrb[36].mxu0 %vm942_vm2, %v1173_v25 }
 0x323   : > { %1905 = vmatpush3.bf16.msra.mxu0 %v1372_v27  ;;  %1906 = vmatprep.mubr.msk.bf16.mxu0 %vm2074_vm0, %v2073_v1 }
 0x324   : > { %v1174_v30 = vpack.c.bf16 %v1170_v29, %v1170_v29  ;;  %1916 = vmatprep.subr.bf16.mxu0 %v2073_v1 }
 0x326   : > { %1901 = vmatmul.mubr.msk.bf16.vlgmr.msra.gmra.mrb[36].mxu1 %vm942_vm2, %v1174_v30 }
 0x327   : > { %1912 = vmatprep.mubr.msk.bf16.mxu1 %vm2074_vm0, %v2073_v1  ;;  %1911 = vmatpush3.bf16.msra.mxu1 %v1418_v32 }
 0x328   : > { %1922 = vmatprep.subr.bf16.mxu1 %v2073_v1 }
 0x3ed   : > { %v1220_v34 = vpop.f32.mrb[32].mxu0 }
 0x3ee   : > { %v1364_v35 = vpack.c.bf16 %v1220_v34, %v1220_v34  ;;  %v1884_v36 = vpop.f32.mrb[33].mxu0 }
 0x3ef   : > { %v1223_v38 = vpop.f32.mrb[34].mxu0 }
 0x3f0   : > { %v1885_v40 = vpop.f32.mrb[35].mxu0  ;;  %1907 = vmatmul.mubr.msk.bf16.vlgmr.msra.gmra.mrb[40].mxu0 %vm942_vm2, %v1364_v35 }
 0x3f1   : > { %v1266_v41 = vpop.f32.mrb[32].mxu1  ;;  %1917 = vmatpush3.bf16.msra.mxu0 %v1464_v37  ;;  %1918 = vmatprep.mubr.msk.bf16.mxu0 %vm2074_vm0, %v2073_v1 }
 0x3f2   : > { %v1365_v42 = vpack.c.bf16 %v1266_v41, %v1266_v41  ;;  %v1890_v43 = vpop.f32.mrb[33].mxu1 }
 0x3f3   : > { %v1269_v45 = vpop.f32.mrb[34].mxu1 }
 0x3f4   : > { %v1891_v46 = vpop.f32.mrb[35].mxu1  ;;  %1913 = vmatmul.mubr.msk.bf16.vlgmr.msra.gmra.mrb[40].mxu1 %vm942_vm2, %v1365_v42 }
 0x3f5   : > { %v1312_v47 = vpop.f32.mrb[36].mxu0  ;;  %1923 = vmatpush3.bf16.msra.mxu1 %v1510_v44  ;;  %1924 = vmatprep.mubr.msk.bf16.mxu1 %vm2074_vm0, %v2073_v1 }
 0x3f6   : > { %v1366_v48 = vpack.c.bf16 %v1312_v47, %v1312_v47  ;;  %v1896_v49 = vpop.f32.mrb[37].mxu0 }
 0x3f7   : > { %v1315_v50 = vpop.f32.mrb[38].mxu0 }
 0x3f8   : > { %v1897_v51 = vpop.f32.mrb[39].mxu0  ;;  %1919 = vmatmul.mubr.msk.bf16.vlgmr.msra.gmra.mrb[44].mxu0 %vm942_vm2, %v1366_v48 }
 0x3f9   : > { %v1358_v52 = vpop.f32.mrb[36].mxu1 }
 0x3fa   : > { %v1367_v53 = vpack.c.bf16 %v1358_v52, %v1358_v52  ;;  %v1902_v54 = vpop.f32.mrb[37].mxu1 }
 0x3fb   : > { %v1361_v55 = vpop.f32.mrb[38].mxu1 }
 0x3fc   : > { %v1903_v56 = vpop.f32.mrb[39].mxu1  ;;  %1925 = vmatmul.mubr.msk.bf16.vlgmr.msra.gmra.mrb[44].mxu1 %vm942_vm2, %v1367_v53 }
 0x4c3   : > { %v1408_v57 = vpop.f32.mrb[40].mxu0 }
 0x4c4   : > { %v1908_v58 = vpop.f32.mrb[41].mxu0  ;;  %v1552_v1 = vsel %vm314_vm1, %v1408_v57, 0.0 }
 0x4c5   : > { %v1411_v59 = vpop.f32.mrb[42].mxu0 }
 0x4c6   : > { %v1909_v60 = vpop.f32.mrb[43].mxu0 }
 0x4c7   : > { %v1454_v61 = vpop.f32.mrb[40].mxu1 }
 0x4c8   : > { %v1553_v62 = vsel %vm314_vm1, %v1454_v61, 0.0  ;;  %v1914_v63 = vpop.f32.mrb[41].mxu1 }
 0x4c9   : > { %v1554_v0 = vadd.f32 %v1553_v62, %v1552_v1  ;;  %v1457_v2 = vpop.f32.mrb[42].mxu1 }
 0x4ca   : > { %v1915_v3 = vpop.f32.mrb[43].mxu1 }
 0x4cb   : > { %v1500_v4 = vpop.f32.mrb[44].mxu0 }
 0x4cc   : > { %v1555_v5 = vsel %vm314_vm1, %v1500_v4, 0.0  ;;  %v1920_v6 = vpop.f32.mrb[45].mxu0 }
 0x4cd   : > { %v1556_v7 = vadd.f32 %v1555_v5, %v1554_v0  ;;  %v1503_v8 = vpop.f32.mrb[46].mxu0 }
 0x4ce   : > { %v1921_v9 = vpop.f32.mrb[47].mxu0 }
 0x4cf   : > { %v1546_v10 = vpop.f32.mrb[44].mxu1 }
 0x4d0   : > { %v1557_v11 = vsel %vm314_vm1, %v1546_v10, 0.0  ;;  %v1926_v13 = vpop.f32.mrb[45].mxu1 }
 0x4d1   : > { %v1558_v14 = vadd.f32 %v1557_v11, %v1556_v7  ;;  %v1549_v15 = vpop.f32.mrb[46].mxu1 }
 0x4d2   : > { %v1927_v16 = vpop.f32.mrb[47].mxu1 }
 0x4d3   : > { %v1566_v17 = vadd.f32 %v1695_v12, %v1558_v14 }
 0x4d5   : > { %1567 = vst.msk [vmem:[%s242_s15] sm:$0xff] %vm314_vm1, %v1566_v17 }
 0x4d6   : > { %2022 = shalt.err (!%p2019_p3)
}
 0x4d7   : > { %s2023_s9 = scalar_lea.hbm %s2410_s19, 128  ;;  %s2027_s12 = scalar_lea.hbm %s2459_s6, 256 }
 0x4d8   : > { %p2024_p4 = scmp.ne.s32.totalorder %s2410_s19, %s2023_s9  ;;  %p2028_p9 = scmp.lt.u32.totalorder %s2410_s19, %s2459_s6 }
 0x4d9   : > { %p2029_p10 = scmp.lt.u32.totalorder %s2027_s12, %s2023_s9  ;;  %p2031_p12 = scmp.lt.u32.totalorder %s2023_s9, %s2410_s19 }
 0x4da   : > { %p2025_p7 = pnand %p2024_p4, %p2149_p5 }
 0x4db   : > { %p2030_p11 = por %p2029_p10, %p2028_p9 }
 0x4dc   : > { %p2026_p8 = pneg %p2025_p7 }
 0x4dd   : > { %p2032_p13 = por %p2031_p12, %p2030_p11 }
 0x4df   : > { %p2033_p0 = pnand %p2032_p13, %p2026_p8 }
 0x4e1   : > { %2036 = shalt.err (!%p2033_p0)
}
 0x4e2   : > { %1928 = dma.vmem_to_hbm [thread:$0]  (%p2149_p5), %s2412_s16, 128, %s2410_s19, %s1569_s20  }
 0x4e3 PF: > { %p1934_p1 = scmp.ge.s32.totalorder %s2071_s24, 2  ;;  %s1594_s15 = sand.u32 1, %s2059_s21  }
 0x4e4   : > { %s1595_s17 = scalar_lea.sflag [#allocation3], %s1594_s15 }
 0x4e5   : > { %p1931_p2 = pnand %p1934_p1, %p2153_p6 }
 0x4e7   : > { %2054 = dma.done.wait (!%p1931_p2), %s1595_s17, 128  }
 0x4e8   : > { %2056 = vsyncadd (!%p1931_p2), %s1595_s17, 4294967168  ;;  %p16_p3 = scmp.ge.s32.totalorder %s2136_s27, 4   ;;  %s2462_s21 = smov %s2063_s22 }
 0x4e9   : > { %s2463_s22 = smov %s2067_s23  ;;  %s2464_s23 = smov %s2147_s30 }
 0x4ea   : > { %s2465_s24 = smov %s2136_s27  ;;  %18 = sbr.rel (!%p16_p3) target bundleno = 3 (0x3), region = 79 }
 0x4f1   :  { %1600 = vsyncpa [#allocation3], 1 }
 0x4f2   :  { %1602 = vsyncpa [#allocation3 + $0x1], 1 }

</bundles_post_ra>
